<compile_context>
chip_gen: v5e
topology: v5e:2x2
jax: 0.10.0
libtpu: 0.0.40
codegen_flags: <defaults>
</compile_context>

<pallas_src>
import functools

import jax
import jax.numpy as jnp
from jax.experimental import pallas as pl
from jax.experimental.pallas import tpu as pltpu


def _softplus(x):
    # Matches F.softplus(x) with beta=1, threshold=20.
    return jnp.where(x > 20.0, x, jnp.log1p(jnp.exp(jnp.minimum(x, 20.0))))


def actor_critic_kernel(state_ref, w1b_ref, w2b_ref, out_ref, *,
                        num_inputs, hidden, num_actions, num_outputs):
    H, A, O, NI = hidden, num_actions, num_outputs, num_inputs

    s = state_ref[...]                                        # (TB, NI) f32

    # Static slices of the folded [W; b] slabs (zero-cost views, aligned rows).
    w1 = w1b_ref[0:NI, :]                                     # (NI, 4H)
    b1 = w1b_ref[NI:NI + 1, :]                                # (1, 4H)
    w2 = w2b_ref[0:4 * H, :]                                  # (4H, OW)
    b2 = w2b_ref[4 * H:4 * H + 1, :]                          # (1, OW)

    # ---- fused first layer: one (TB, NI) x (NI, 4H) MXU matmul
    z1 = jnp.dot(s, w1, preferred_element_type=jnp.float32) + b1

    # Per-block nonlinearity via a (1, 4H) lane-index mask (broadcasts over rows):
    #   [0,  H)  relu      -> critic hidden
    #   [H, 2H)  softplus  -> actor hidden (policy path)
    #   [2H,4H)  identity  -> alpha_2 / beta_2 inputs
    c1 = jax.lax.broadcasted_iota(jnp.int32, (1, 4 * H), 1)
    sp1 = _softplus(z1)
    act = jnp.where(c1 < H, jnp.maximum(z1, 0.0),
          jnp.where(c1 < 2 * H, sp1, z1))

    # ---- fused block-diagonal second layer: (TB, 4H) x (4H, OW)
    # packed columns: [value | policy logits(A) | alpha_2(O) | beta_2(O) | 0 pad]
    z2 = jnp.dot(act, w2, preferred_element_type=jnp.float32) + b2

    OW = out_ref.shape[-1]
    c2 = jax.lax.broadcasted_iota(jnp.int32, (1, OW), 1)
    is_act = (c2 >= 1) & (c2 < 1 + A)
    is_ab = (c2 >= 1 + A) & (c2 < 1 + A + 2 * O)

    # One shared exp pass over z2:
    #   actor cols      -> exp(z2 - rowmax)   (softmax numerator)
    #   alpha/beta cols -> exp(min(z2, 20))   (softplus input)
    m = jnp.max(jnp.where(is_act, z2, -jnp.inf), axis=-1, keepdims=True)
    e = jnp.exp(jnp.where(is_act, z2 - m, jnp.minimum(z2, 20.0)))

    e_act = jnp.where(is_act, e, 0.0)
    probs = e_act / jnp.sum(e_act, axis=-1, keepdims=True)    # exact divide (review fix)

    sp2 = jnp.where(z2 > 20.0, z2, jnp.log1p(e))              # softplus for alpha/beta cols

    # Single lane-dense packed store: [value | policy | softplus(x) | softplus(y) | 0]
    out = jnp.where(c2 < 1, z2,
          jnp.where(is_act, probs,
          jnp.where(is_ab, sp2, 0.0)))
    out_ref[...] = out.astype(out_ref.dtype)


def init_params(key, num_inputs, num_actions, hidden_size, num_outputs):
    """Deterministic init mimicking PyTorch's uniform(-1/sqrt(fan_in), 1/sqrt(fan_in))."""
    def linear(k, fan_in, fan_out):
        kw, kb = jax.random.split(k)
        bound = 1.0 / jnp.sqrt(jnp.asarray(fan_in, jnp.float32))
        w = jax.random.uniform(kw, (fan_in, fan_out), jnp.float32, -bound, bound)
        b = jax.random.uniform(kb, (1, fan_out), jnp.float32, -bound, bound)
        return w, b

    keys = jax.random.split(key, 7)
    wc1, bc1 = linear(keys[0], num_inputs, hidden_size)       # critic_linear1
    wc2, bc2 = linear(keys[1], hidden_size, 1)                # critic_linear2
    wact, bact = linear(keys[2], hidden_size, num_actions)    # actor_linear2
    wa1, ba1 = linear(keys[3], num_inputs, hidden_size)       # alpha_1
    wa2, ba2 = linear(keys[4], hidden_size, num_outputs)      # alpha_2
    wb1, bb1 = linear(keys[5], num_inputs, hidden_size)       # beta_1
    wb2, bb2 = linear(keys[6], hidden_size, num_outputs)      # beta_2
    return (wc1, bc1, wc2, bc2, wact, bact,
            wa1, ba1, wa2, ba2, wb1, bb1, wb2, bb2)


def pack_params(params, num_inputs, hidden, num_actions, num_outputs, out_width):
    """Pack the 14 logical params into 2 fused [W; b] slabs.

    Done ONCE outside the per-step forward path (hoisted per the perf review).
    """
    (wc1, bc1, wc2, bc2, wact, bact,
     wa1, ba1, wa2, ba2, wb1, bb1, wb2, bb2) = params
    H, A, O, NI = hidden, num_actions, num_outputs, num_inputs

    # Fused first layer (alpha_1 duplicated for its two uses) + bias row + zero pad.
    w1 = jnp.concatenate([wc1, wa1, wa1, wb1], axis=1)        # (NI, 4H)
    b1 = jnp.concatenate([bc1, ba1, ba1, bb1], axis=1)        # (1, 4H)
    rows1 = ((NI + 1 + 7) // 8) * 8
    w1b = jnp.zeros((rows1, 4 * H), jnp.float32)
    w1b = w1b.at[:NI, :].set(w1)
    w1b = w1b.at[NI:NI + 1, :].set(b1)

    # Fused block-diagonal second layer + bias row + zero pad, lane-padded to out_width.
    rows2 = ((4 * H + 1 + 7) // 8) * 8
    w2b = jnp.zeros((rows2, out_width), jnp.float32)
    w2b = w2b.at[0 * H:1 * H, 0:1].set(wc2)
    w2b = w2b.at[1 * H:2 * H, 1:1 + A].set(wact)
    w2b = w2b.at[2 * H:3 * H, 1 + A:1 + A + O].set(wa2)
    w2b = w2b.at[3 * H:4 * H, 1 + A + O:1 + A + 2 * O].set(wb2)

    b2 = jnp.zeros((1, out_width), jnp.float32)
    b2 = b2.at[:, 0:1].set(bc2)
    b2 = b2.at[:, 1:1 + A].set(bact)
    b2 = b2.at[:, 1 + A:1 + A + O].set(ba2)
    b2 = b2.at[:, 1 + A + O:1 + A + 2 * O].set(bb2)
    w2b = w2b.at[4 * H:4 * H + 1, :].set(b2)
    return w1b, w2b


def _choose_batch_tile(B):
    # Multiple of 8 (sublane), cap 1024 (per-tile VMEM ~1.2 MiB double-buffered),
    # and >= 2 grid steps whenever B > 8 so v7x's 2nd TensorCore gets work.
    if B <= 8:
        return B
    tb = -(-B // 2)                  # cdiv(B, 2)
    tb = ((tb + 7) // 8) * 8
    return min(1024, tb)


def actor_critic_packed_call(state, w1b, w2b, *, hidden, num_actions,
                             num_outputs, out_width, out_dtype=jnp.float32):
    B, NI = state.shape
    H = hidden
    TB = _choose_batch_tile(B)
    grid = (pl.cdiv(B, TB),)

    kernel = functools.partial(actor_critic_kernel, num_inputs=NI, hidden=H,
                               num_actions=num_actions, num_outputs=num_outputs)

    return pl.pallas_call(
        kernel,
        out_shape=jax.ShapeDtypeStruct((B, out_width), out_dtype),
        grid_spec=pltpu.PrefetchScalarGridSpec(
            num_scalar_prefetch=0,
            grid=grid,
            in_specs=[
                pl.BlockSpec((TB, NI), lambda i: (i, 0)),          # state tile (pipelined)
                pl.BlockSpec(w1b.shape, lambda i: (0, 0)),         # [W1; b1] resident
                pl.BlockSpec(w2b.shape, lambda i: (0, 0)),         # [W2; b2] resident
            ],
            out_specs=pl.BlockSpec((TB, out_width), lambda i: (i, 0)),
        ),
        compiler_params=pltpu.CompilerParams(
            dimension_semantics=("parallel",)),                    # both TCs on v7x
    )(state, w1b, w2b)


def actor_critic_forward(state, w1b, w2b, sample_key, *, hidden, num_actions,
                         num_outputs, out_width, out_dtype=jnp.float32):
    A, O = num_actions, num_outputs
    packed = actor_critic_packed_call(state, w1b, w2b, hidden=hidden,
                                      num_actions=A, num_outputs=O,
                                      out_width=out_width, out_dtype=out_dtype)

    value = packed[:, 0:1]
    policy_dist = packed[:, 1:1 + A]
    x = packed[:, 1 + A:1 + A + O]
    y = packed[:, 1 + A + O:1 + A + 2 * O]

    # TODO(synk): torch.distributions.Gamma(...).sample() (rejection sampling) has no
    # clean in-kernel Pallas equivalent; gamma sampling stays in plain JAX here, and
    # the Gamma "objects" are returned as (concentration, rate) tuples.
    ka, kb = jax.random.split(sample_key)
    conc_a, rate_a = x[0, 0], x[0, 1]
    conc_b, rate_b = y[0, 0], y[0, 1]
    z_alpha = jax.random.gamma(ka, conc_a, shape=(1,)) / rate_a
    z_beta = jax.random.gamma(kb, conc_b, shape=(1,)) / rate_b
    gam_a = (conc_a, rate_a)
    gam_b = (conc_b, rate_b)
    return value, z_alpha, z_beta, policy_dist, x, y, gam_a, gam_b


def _reference_forward(state, params):
    """Plain-JAX reference matching the PyTorch forward (for correctness check)."""
    (wc1, bc1, wc2, bc2, wact, bact,
     wa1, ba1, wa2, ba2, wb1, bb1, wb2, bb2) = params
    h_c = jnp.maximum(state @ wc1 + bc1, 0.0)
    value = h_c @ wc2 + bc2
    h_a = state @ wa1 + ba1
    x = _softplus(h_a @ wa2 + ba2)
    h_b = state @ wb1 + bb1
    y = _softplus(h_b @ wb2 + bb2)
    logits = _softplus(h_a) @ wact + bact
    policy = jax.nn.softmax(logits, axis=-1)
    return value, policy, x, y


if __name__ == "__main__":
    # Small shapes consistent with the module's forward.
    B = 8
    num_inputs = 16
    hidden_size = 32          # 4*hidden = 128 -> one lane-dense MXU tile
    num_actions = 4
    num_outputs = 2           # fixed module-level constant in the original script

    root = jax.random.PRNGKey(0)
    k_params, k_state, k_sample = jax.random.split(root, 3)

    params = init_params(k_params, num_inputs, num_actions, hidden_size, num_outputs)
    state = jax.random.normal(k_state, (B, num_inputs), jnp.float32)

    needed = 1 + num_actions + 2 * num_outputs
    out_width = max(128, ((needed + 127) // 128) * 128)

    # Pack ONCE (hoisted out of the per-call path), then reuse across forward calls.
    w1b, w2b = pack_params(params, num_inputs, hidden_size, num_actions,
                           num_outputs, out_width)
    w1b, w2b = jax.device_put(w1b), jax.device_put(w2b)

    fwd = jax.jit(functools.partial(
        actor_critic_forward, hidden=hidden_size, num_actions=num_actions,
        num_outputs=num_outputs, out_width=out_width, out_dtype=jnp.float32))

    outs = fwd(state, w1b, w2b, k_sample)
    outs = jax.block_until_ready(outs)

    value, z_alpha, z_beta, policy_dist, x, y, gam_a, gam_b = outs
    assert value.shape == (B, 1)
    assert z_alpha.shape == (1,) and z_beta.shape == (1,)
    assert policy_dist.shape == (B, num_actions)
    assert x.shape == (B, num_outputs) and y.shape == (B, num_outputs)

    # softmax rows sum to 1 (exact divide now)
    assert jnp.allclose(jnp.sum(policy_dist, axis=-1), 1.0, atol=1e-5)
    # softplus outputs are positive (valid Gamma params)
    assert bool(jnp.all(x > 0)) and bool(jnp.all(y > 0))

    # correctness vs plain-JAX reference
    v_ref, p_ref, x_ref, y_ref = _reference_forward(state, params)
    assert jnp.allclose(value, v_ref, rtol=1e-4, atol=1e-4)
    assert jnp.allclose(policy_dist, p_ref, rtol=1e-4, atol=1e-4)
    assert jnp.allclose(x, x_ref, rtol=1e-4, atol=1e-4)
    assert jnp.allclose(y, y_ref, rtol=1e-4, atol=1e-4)

    print("KERNEL_OK")
</pallas_src>

<mosaic_0001>
module attributes {stable_mosaic.version = 11 : i64} {
  func.func @actor_critic_kernel(%arg0: i32, %arg1: memref<8x16xf32, #tpu.memory_space<vmem>>, %arg2: memref<24x128xf32, #tpu.memory_space<vmem>>, %arg3: memref<136x128xf32, #tpu.memory_space<vmem>>, %arg4: memref<8x128xf32, #tpu.memory_space<vmem>>) attributes {dimension_semantics = [#tpu.dimension_semantics<parallel>], iteration_bounds = array<i64: 1>, scalar_prefetch = 0 : i64, scratch_operands = 0 : i64, tpu.core_type = #tpu.core_type<tc>, window_params = [{transform_indices = @transform_0, window_bounds = array<i64: 8, 16>}, {pipeline_mode = #tpu.pipeline_mode<synchronous>, transform_indices = @transform_1, window_bounds = array<i64: 24, 128>}, {pipeline_mode = #tpu.pipeline_mode<synchronous>, transform_indices = @transform_2, window_bounds = array<i64: 136, 128>}, {transform_indices = @transform_3, window_bounds = array<i64: 8, 128>}]} {
    %c0 = arith.constant 0 : index
    %c0_0 = arith.constant 0 : index
    %0 = vector.load %arg1[%c0, %c0_0] : memref<8x16xf32, #tpu.memory_space<vmem>>, vector<8x16xf32>
    %c0_1 = arith.constant 0 : index
    %c0_2 = arith.constant 0 : index
    %1 = vector.load %arg2[%c0_1, %c0_2] : memref<24x128xf32, #tpu.memory_space<vmem>>, vector<16x128xf32>
    %c16 = arith.constant 16 : index
    %c0_3 = arith.constant 0 : index
    %2 = vector.load %arg2[%c16, %c0_3] : memref<24x128xf32, #tpu.memory_space<vmem>>, vector<1x128xf32>
    %c0_4 = arith.constant 0 : index
    %c0_5 = arith.constant 0 : index
    %3 = vector.load %arg3[%c0_4, %c0_5] : memref<136x128xf32, #tpu.memory_space<vmem>>, vector<128x128xf32>
    %c128 = arith.constant 128 : index
    %c0_6 = arith.constant 0 : index
    %4 = vector.load %arg3[%c128, %c0_6] : memref<136x128xf32, #tpu.memory_space<vmem>>, vector<1x128xf32>
    %cst = arith.constant dense<0.000000e+00> : vector<8x128xf32>
    %5 = tpu.matmul %0, %1, %cst {dimension_numbers = #tpu.dot_dimension_numbers<[1], [0], [0], [1], [0, 0, 1, 1], [], []>} : vector<8x16xf32>, vector<16x128xf32>, vector<8x128xf32> -> vector<8x128xf32>
    %6 = vector.broadcast %2 : vector<1x128xf32> to vector<8x128xf32>
    %7 = arith.addf %5, %6 : vector<8x128xf32>
    %8 = tpu.iota {dimensions = array<i32: 1>} : vector<1x128xi32>
    %cst_7 = arith.constant 2.000000e+01 : f32
    %9 = vector.broadcast %cst_7 : f32 to vector<8x128xf32>
    %10 = arith.cmpf ogt, %7, %9 : vector<8x128xf32>
    %cst_8 = arith.constant 2.000000e+01 : f32
    %11 = vector.broadcast %cst_8 : f32 to vector<8x128xf32>
    %12 = arith.minimumf %7, %11 : vector<8x128xf32>
    %13 = math.exp %12 : vector<8x128xf32>
    %14 = math.log1p %13 : vector<8x128xf32>
    %15 = arith.select %10, %7, %14 : vector<8x128xi1>, vector<8x128xf32>
    %c32_i32 = arith.constant 32 : i32
    %16 = vector.broadcast %c32_i32 : i32 to vector<1x128xi32>
    %17 = arith.cmpi slt, %8, %16 : vector<1x128xi32>
    %cst_9 = arith.constant 0.000000e+00 : f32
    %18 = vector.broadcast %cst_9 : f32 to vector<8x128xf32>
    %19 = arith.maximumf %7, %18 : vector<8x128xf32>
    %c64_i32 = arith.constant 64 : i32
    %20 = vector.broadcast %c64_i32 : i32 to vector<1x128xi32>
    %21 = arith.cmpi slt, %8, %20 : vector<1x128xi32>
    %22 = vector.shape_cast %21 : vector<1x128xi1> to vector<1x128xi1>
    %23 = vector.broadcast %22 : vector<1x128xi1> to vector<8x128xi1>
    %24 = arith.select %23, %15, %7 : vector<8x128xi1>, vector<8x128xf32>
    %25 = vector.shape_cast %17 : vector<1x128xi1> to vector<1x128xi1>
    %26 = vector.broadcast %25 : vector<1x128xi1> to vector<8x128xi1>
    %27 = arith.select %26, %19, %24 : vector<8x128xi1>, vector<8x128xf32>
    %cst_10 = arith.constant dense<0.000000e+00> : vector<8x128xf32>
    %28 = tpu.matmul %27, %3, %cst_10 {dimension_numbers = #tpu.dot_dimension_numbers<[1], [0], [0], [1], [0, 0, 1, 1], [], []>} : vector<8x128xf32>, vector<128x128xf32>, vector<8x128xf32> -> vector<8x128xf32>
    %29 = vector.broadcast %4 : vector<1x128xf32> to vector<8x128xf32>
    %30 = arith.addf %28, %29 : vector<8x128xf32>
    %31 = tpu.iota {dimensions = array<i32: 1>} : vector<1x128xi32>
    %c1_i32 = arith.constant 1 : i32
    %32 = vector.broadcast %c1_i32 : i32 to vector<1x128xi32>
    %33 = arith.cmpi sge, %31, %32 : vector<1x128xi32>
    %c5_i32 = arith.constant 5 : i32
    %34 = vector.broadcast %c5_i32 : i32 to vector<1x128xi32>
    %35 = arith.cmpi slt, %31, %34 : vector<1x128xi32>
    %36 = arith.andi %33, %35 : vector<1x128xi1>
    %c5_i32_11 = arith.constant 5 : i32
    %37 = vector.broadcast %c5_i32_11 : i32 to vector<1x128xi32>
    %38 = arith.cmpi sge, %31, %37 : vector<1x128xi32>
    %c9_i32 = arith.constant 9 : i32
    %39 = vector.broadcast %c9_i32 : i32 to vector<1x128xi32>
    %40 = arith.cmpi slt, %31, %39 : vector<1x128xi32>
    %41 = arith.andi %38, %40 : vector<1x128xi1>
    %cst_12 = arith.constant 0xFF800000 : f32
    %42 = vector.shape_cast %36 : vector<1x128xi1> to vector<1x128xi1>
    %43 = vector.broadcast %42 : vector<1x128xi1> to vector<8x128xi1>
    %44 = vector.broadcast %cst_12 : f32 to vector<8x128xf32>
    %45 = arith.select %43, %30, %44 : vector<8x128xi1>, vector<8x128xf32>
    %cst_13 = arith.constant dense<0xFF800000> : vector<8xf32>
    %46 = vector.multi_reduction <maximumf>, %45, %cst_13 [1] : vector<8x128xf32> to vector<8xf32>
    %47 = vector.shape_cast %46 : vector<8xf32> to vector<8x1xf32>
    %48 = vector.broadcast %47 : vector<8x1xf32> to vector<8x128xf32>
    %49 = arith.subf %30, %48 : vector<8x128xf32>
    %cst_14 = arith.constant 2.000000e+01 : f32
    %50 = vector.broadcast %cst_14 : f32 to vector<8x128xf32>
    %51 = arith.minimumf %30, %50 : vector<8x128xf32>
    %52 = vector.shape_cast %36 : vector<1x128xi1> to vector<1x128xi1>
    %53 = vector.broadcast %52 : vector<1x128xi1> to vector<8x128xi1>
    %54 = arith.select %53, %49, %51 : vector<8x128xi1>, vector<8x128xf32>
    %55 = math.exp %54 : vector<8x128xf32>
    %cst_15 = arith.constant 0.000000e+00 : f32
    %56 = vector.shape_cast %36 : vector<1x128xi1> to vector<1x128xi1>
    %57 = vector.broadcast %56 : vector<1x128xi1> to vector<8x128xi1>
    %58 = vector.broadcast %cst_15 : f32 to vector<8x128xf32>
    %59 = arith.select %57, %55, %58 : vector<8x128xi1>, vector<8x128xf32>
    %cst_16 = arith.constant dense<0.000000e+00> : vector<8xf32>
    %60 = vector.multi_reduction <add>, %59, %cst_16 [1] : vector<8x128xf32> to vector<8xf32>
    %61 = vector.shape_cast %60 : vector<8xf32> to vector<8x1xf32>
    %62 = vector.broadcast %61 : vector<8x1xf32> to vector<8x128xf32>
    %63 = arith.divf %59, %62 : vector<8x128xf32>
    %cst_17 = arith.constant 2.000000e+01 : f32
    %64 = vector.broadcast %cst_17 : f32 to vector<8x128xf32>
    %65 = arith.cmpf ogt, %30, %64 : vector<8x128xf32>
    %66 = math.log1p %55 : vector<8x128xf32>
    %67 = arith.select %65, %30, %66 : vector<8x128xi1>, vector<8x128xf32>
    %c1_i32_18 = arith.constant 1 : i32
    %68 = vector.broadcast %c1_i32_18 : i32 to vector<1x128xi32>
    %69 = arith.cmpi slt, %31, %68 : vector<1x128xi32>
    %cst_19 = arith.constant 0.000000e+00 : f32
    %70 = vector.shape_cast %41 : vector<1x128xi1> to vector<1x128xi1>
    %71 = vector.broadcast %70 : vector<1x128xi1> to vector<8x128xi1>
    %72 = vector.broadcast %cst_19 : f32 to vector<8x128xf32>
    %73 = arith.select %71, %67, %72 : vector<8x128xi1>, vector<8x128xf32>
    %74 = vector.shape_cast %36 : vector<1x128xi1> to vector<1x128xi1>
    %75 = vector.broadcast %74 : vector<1x128xi1> to vector<8x128xi1>
    %76 = arith.select %75, %63, %73 : vector<8x128xi1>, vector<8x128xf32>
    %77 = vector.shape_cast %69 : vector<1x128xi1> to vector<1x128xi1>
    %78 = vector.broadcast %77 : vector<1x128xi1> to vector<8x128xi1>
    %79 = arith.select %78, %30, %76 : vector<8x128xi1>, vector<8x128xf32>
    %c0_20 = arith.constant 0 : index
    %c0_21 = arith.constant 0 : index
    %80 = vector.load %arg4[%c0_20, %c0_21] : memref<8x128xf32, #tpu.memory_space<vmem>>, vector<8x128xf32>
    tpu.vector_store %arg4[%c0_20, %c0_21], %79 {strides = array<i32>} : memref<8x128xf32, #tpu.memory_space<vmem>>, vector<8x128xf32>,
    return
  }
  func.func @transform_0(%arg0: i32) -> (i32, i32) {
    %c0_i32 = arith.constant 0 : i32
    %c0_i32_0 = arith.constant 0 : i32
    return %arg0, %c0_i32 : i32, i32
  }
  func.func @transform_1(%arg0: i32) -> (i32, i32) {
    %c0_i32 = arith.constant 0 : i32
    %c0_i32_0 = arith.constant 0 : i32
    %c0_i32_1 = arith.constant 0 : i32
    return %c0_i32, %c0_i32_0 : i32, i32
  }
  func.func @transform_2(%arg0: i32) -> (i32, i32) {
    %c0_i32 = arith.constant 0 : i32
    %c0_i32_0 = arith.constant 0 : i32
    %c0_i32_1 = arith.constant 0 : i32
    return %c0_i32, %c0_i32_0 : i32, i32
  }
  func.func @transform_3(%arg0: i32) -> (i32, i32) {
    %c0_i32 = arith.constant 0 : i32
    %c0_i32_0 = arith.constant 0 : i32
    return %arg0, %c0_i32 : i32, i32
  }
}

</mosaic_0001>

<bundles_post_ra>
// kernel: actor_critic_forward.3
= control target key start
LH: loop header
LB: loop body
LE: loop exit
PB: predicated region body
PF: predicated region fallthrough
CT: control target
= control target key end

     0   :  { %vm36_vm0 = vcmask 130048   ;;  %v60_v27 = vlaneseq  ;;  %s284_s1 = inlined_call_operand.vmem [shape: f32[24,128], index: 1, kind: input, shape index: {}]   ;;  %s285_s0 = inlined_call_operand.vmem [shape: f32[8,16], index: 0, kind: input, shape index: {}]   ;;  %s286_s2 = inlined_call_operand.vmem [shape: f32[136,128], index: 2, kind: input, shape index: {}]   ;;  %s287_s3 = inlined_call_operand.vmem [shape: f32[8,128], index: 3, kind: output, shape index: {}]  }
   0x1   :  { %v16_v0 = vld [vmem:[%s284_s1 + $0x8] sm:$0xff]  ;;  %v15_v1 = vld [vmem:[%s284_s1] sm:$0xff]  ;;  %v33_v3 = vld [vmem:[%s286_s2 + $0x78] sm:$0xff] }
   0x2   :  { %54 = vmatpush.msra.mxu0 %v16_v0  ;;  %v14_v2 = vld [vmem:[%s285_s0] sm:$0xff]  ;;  %86 = vmatpush.msra.mxu1 %v33_v3  ;;  %v32_v4 = vld [vmem:[%s286_s2 + $0x70] sm:$0xff]  ;;  %v31_v5 = vld [vmem:[%s286_s2 + $0x68] sm:$0xff]  ;;  %v257_v29 = vand.u32 127, %v60_v27 }
   0x3   :  { %v30_v6 = vld [vmem:[%s286_s2 + $0x60] sm:$0xff]  ;;  %v29_v7 = vld [vmem:[%s286_s2 + $0x58] sm:$0xff]  ;;  %v28_v8 = vld [vmem:[%s286_s2 + $0x50] sm:$0xff] }
   0x4   :  { %55 = vmatpush.msra.mxu0 %v15_v1  ;;  %87 = vmatpush.msra.mxu1 %v32_v4  ;;  %v27_v9 = vld [vmem:[%s286_s2 + $0x48] sm:$0xff]  ;;  %v26_v10 = vld [vmem:[%s286_s2 + $0x40] sm:$0xff]  ;;  %v25_v11 = vld [vmem:[%s286_s2 + $0x38] sm:$0xff]  ;;  %vm78_vm2 = vcmp.lt.s32.totalorder %v257_v29, 64  ;;  %vm76_vm4 = vcmp.lt.s32.totalorder %v257_v29, 32  ;;  %vm106_vm5 = vcmp.ge.s32.totalorder %v257_v29, 1 }
   0x5   :  { %164 = vmatmul.msk.f32.vlgmr.msra.gmra.mxu0 %vm36_vm0, %v14_v2  ;;  %v24_v12 = vld [vmem:[%s286_s2 + $0x30] sm:$0xff]  ;;  %v23_v13 = vld [vmem:[%s286_s2 + $0x28] sm:$0xff]  ;;  %v22_v14 = vld [vmem:[%s286_s2 + $0x20] sm:$0xff]  ;;  %vm107_vm6 = vcmp.lt.s32.totalorder %v257_v29, 5  ;;  %vm109_vm10 = vcmp.ge.s32.totalorder %v257_v29, 5  ;;  %vm110_vm11 = vcmp.lt.s32.totalorder %v257_v29, 9 }
   0x6   :  { %88 = vmatpush.msra.mxu1 %v31_v5  ;;  %v21_v15 = vld [vmem:[%s286_s2 + $0x18] sm:$0xff]  ;;  %v20_v16 = vld [vmem:[%s286_s2 + $0x10] sm:$0xff]  ;;  %v19_v17 = vld [vmem:[%s286_s2 + $0x8] sm:$0xff] }
   0x7   :  { %v18_v18 = vld [vmem:[%s286_s2] sm:$0xff]  ;;  %v165_v19 = vld [vmem:[%s284_s1 + $0x10] ss:$0 sm:$0xff]  ;;  %vm266_vm7 = vmand %vm106_vm5, %vm107_vm6 }
   0x8   :  { %89 = vmatpush.msra.mxu1 %v30_v6  ;;  %v166_v39 = vld [vmem:[%s286_s2 + $0x80] ss:$0 sm:$0xff]  ;;  %vm111_vm15 = vmand %vm109_vm10, %vm110_vm11 }
   0xa   :  { %90 = vmatpush.msra.mxu1 %v29_v7 }
   0xc   :  { %91 = vmatpush.msra.mxu1 %v28_v8 }
   0xe   :  { %92 = vmatpush.msra.mxu1 %v27_v9 }
  0x10   :  { %93 = vmatpush.msra.mxu1 %v26_v10 }
  0x12   :  { %94 = vmatpush.msra.mxu1 %v25_v11 }
  0x14   :  { %95 = vmatpush.msra.mxu1 %v24_v12 }
  0x16   :  { %96 = vmatpush.msra.mxu1 %v23_v13 }
  0x18   :  { %97 = vmatpush.msra.mxu1 %v22_v14 }
  0x1a   :  { %98 = vmatpush.msra.mxu1 %v21_v15 }
  0x1c   :  { %99 = vmatpush.msra.mxu1 %v20_v16 }
  0x1e   :  { %100 = vmatpush.msra.mxu1 %v19_v17 }
  0x20   :  { %101 = vmatpush.msra.mxu1 %v18_v18 }
  0x82   :  { %v57_v20 = vpop.f32.mrf.mxu0 }
  0x83   :  { %v58_v21 = vadd.f32 %v165_v19, %v57_v20 }
  0x85   :  { %v63_v22 = vmin.f32 %v58_v21, 20.0  ;;  %vm62_vm3 = vcmp.gt.f32.partialorder %v58_v21, 20.0  ;;  %v77_v36 = vmax.f32 %v58_v21, 0.0 }
  0x87   :  { %v64_v23 = vmul.f32 1.442695, %v63_v22 }
  0x89   :  { %167 = vpow2.f32 %v64_v23 }
  0x8f   :  { %v168_v24 = vpop.eup %167 }
  0x90   :  { %v66_v25 = vadd.f32 1.0, %v168_v24  ;;  %v69_v26 = vmul.f32 -0.5, %v168_v24  ;;  %v72_v30 = vand.u32 2147483647, %v168_v24 }
  0x92   :  { %169 = vlog2.f32 %v66_v25  ;;  %v70_v28 = vadd.f32 1.0, %v69_v26  ;;  %vm73_vm1 = vcmp.lt.f32.partialorder %v72_v30, 0.0004427343 }
  0x94   :  { %v71_v33 = vmul.f32 %v168_v24, %v70_v28 }
  0x98   :  { %v170_v31 = vpop.eup %169 }
  0x99   :  { %v68_v32 = vmul.f32 0.6931472, %v170_v31 }
  0x9b   :  { %v74_v34 = vsel %vm73_vm1, %v71_v33, %v68_v32  ;;  %vm151_vm1 = vcmp.lt.s32.totalorder %v257_v29, 1 }
  0x9c   :  { %v75_v35 = vsel %vm62_vm3, %v58_v21, %v74_v34 }
  0x9d   :  { %v81_v37 = vsel %vm78_vm2, %v75_v35, %v58_v21 }
  0x9e   :  { %v84_v38 = vsel %vm76_vm4, %v77_v36, %v81_v37 }
  0x9f   :  { %102 = vmatmul.f32.vlgmr.msra.gmra.mxu1 %v84_v38 }
 0x11c   :  { %v103_v40 = vpop.f32.mrf.mxu1 }
 0x11d   :  { %v104_v42 = vadd.f32 %v166_v39, %v103_v40 }
 0x11f   :  { %v114_v43 = vsel %vm266_vm7, %v104_v42, -inf  ;;  %v118_v45 = vmin.f32 %v104_v42, 20.0  ;;  %vm140_vm13 = vcmp.gt.f32.partialorder %v104_v42, 20.0 }
 0x120   :  { %115 = vmax.xlane.f32.xlu0 %v114_v43 }
 0x193   :  { %v116_v44 = vpop.xlane.xlu0 %115 }
 0x194   :  { %v117_v46 = vsub.f32 %v104_v42, %v116_v44 }
 0x196   :  { %v119_v47 = vsel %vm266_vm7, %v117_v46, %v118_v45 }
 0x197   :  { %v120_v48 = vmul.f32 1.442695, %v119_v47 }
 0x199   :  { %171 = vpow2.f32 %v120_v48 }
 0x19f   :  { %v172_v49 = vpop.eup %171 }
 0x1a0   :  { %v122_v50 = vsel %vm266_vm7, %v172_v49, 0.0  ;;  %v141_v51 = vadd.f32 1.0, %v172_v49  ;;  %v144_v53 = vmul.f32 -0.5, %v172_v49  ;;  %v147_v57 = vand.u32 2147483647, %v172_v49 }
 0x1a1   :  { %123 = vadd.xlane.f32.xlu0 %v122_v50 }
 0x1a2   :  { %173 = vlog2.f32 %v141_v51  ;;  %v145_v56 = vadd.f32 1.0, %v144_v53  ;;  %vm148_vm8 = vcmp.lt.f32.partialorder %v147_v57, 0.0004427343 }
 0x1a4   :  { %v146_v61 = vmul.f32 %v172_v49, %v145_v56 }
 0x1a8   :  { %v174_v54 = vpop.eup %173 }
 0x1a9   :  { %v143_v59 = vmul.f32 0.6931472, %v174_v54 }
 0x1ab   :  { %v149_v1 = vsel %vm148_vm8, %v146_v61, %v143_v59 }
 0x1ac   :  { %v150_v4 = vsel %vm140_vm13, %v104_v42, %v149_v1 }
 0x1ad   :  { %v154_v8 = vsel %vm111_vm15, %v150_v4, 0.0 }
 0x214   :  { %v124_v52 = vpop.xlane.xlu0 %123 }
 0x215   :  { %175 = vrcp.f32 %v124_v52  ;;  %v136_v62 = vand.u32 2147483648, %v124_v52  ;;  %v134_v0 = vand.u32 2147483647, %v124_v52  ;;  %vm130_vm12 = vweird.f32 %v124_v52 }
 0x217   :  { %v137_v3 = vor.u32 1.1754944e-38, %v136_v62  ;;  %vm135_vm0 = vcmp.eq.f32.partialorder %v134_v0, 8.507059e+37 }
 0x21b   :  { %v176_v55 = vpop.eup %175 }
 0x21c   :  { %v126_v58 = vmul.f32 %v176_v55, %v124_v52  ;;  %vm131_vm9 = vweird.f32 %v176_v55 }
 0x21d   :  { %vm132_vm14 = vmor %vm130_vm12, %vm131_vm9 }
 0x21e   :  { %v127_v60 = vsub.f32 1.0, %v126_v58 }
 0x220   :  { %v128_v63 = vmul.f32 %v176_v55, %v127_v60 }
 0x222   :  { %v129_v2 = vadd.f32 %v176_v55, %v128_v63 }
 0x224   :  { %v133_v5 = vsel %vm132_vm14, %v176_v55, %v129_v2 }
 0x225   :  { %v138_v6 = vsel %vm135_vm0, %v137_v3, %v133_v5 }
 0x226   :  { %v139_v7 = vmul.f32 %v138_v6, %v122_v50 }
 0x228   :  { %v155_v9 = vsel %vm266_vm7, %v139_v7, %v154_v8 }
 0x229   :  { %v158_v10 = vsel %vm151_vm1, %v104_v42, %v155_v9 }
 0x22a   :  { %159 = vst [vmem:[%s287_s3] sm:$0xff] %v158_v10 }

</bundles_post_ra>
